<compile_context>
chip_gen: v5e
topology: v5e:2x2
jax: 0.10.0
libtpu: 0.0.40
codegen_flags: <defaults>
</compile_context>

<pallas_src>
import functools
import math

import jax
import jax.numpy as jnp
from jax import lax
from jax.experimental import pallas as pl
from jax.experimental.pallas import tpu as pltpu


def _round_up(x, m):
    return ((x + m - 1) // m) * m


def _lcm(a, b):
    return a * b // math.gcd(a, b)


def _vmem_budget_bytes():
    """~80% of this generation's physical VMEM (v7x 64 MiB, v5e/v6e 128 MiB)."""
    cap = 64 * 1024 * 1024            # conservative fallback (v7x physical size)
    try:
        info = pltpu.get_tpu_info()
        cap = int(getattr(info, "vmem_capacity_bytes", cap)) or cap
    except Exception:
        pass
    return max(32 * 1024 * 1024, int(cap * 0.8))


def _largest_divisor_tile(n_pad, cap, fits):
    """Largest 128-multiple tile that divides n_pad, is <= cap and fits VMEM."""
    cands = [t for t in (4096, 2048, 1024, 512, 256, 128)
             if t <= min(n_pad, cap) and n_pad % t == 0]
    for t in cands:
        if fits(t):
            return t
    return cands[-1] if cands else n_pad


# ---------------------------------------------------------------------------
# K1: XW = X @ W   (per view, row-tiled; bf16 inputs, f32 MXU acc, bf16 out)
# ---------------------------------------------------------------------------
def _xw_kernel(x_ref, w_ref, xw_ref):
    acc = jnp.dot(x_ref[0], w_ref[...], preferred_element_type=jnp.float32)
    xw_ref[0] = acc.astype(xw_ref.dtype)


# ---------------------------------------------------------------------------
# K2: H = A_hat @ XW with fused per-column sum / sum-of-squares.
#   grid = (view, row_tile i, k_tile k); k is the reduction axis (last).
#   H block is resident across k; the stats blocks are resident across i and k.
# ---------------------------------------------------------------------------
def _agg_stats_kernel(a_ref, xw_ref, h_ref, sum_ref, sqsum_ref,
                      *, tile_k, xw_resident):
    i = pl.program_id(1)
    k = pl.program_id(2)
    k_last = pl.num_programs(2) - 1

    # Zero the per-view column statistics once, at the first tile of the view.
    @pl.when(jnp.logical_and(i == 0, k == 0))
    def _():
        sum_ref[...] = jnp.zeros_like(sum_ref)
        sqsum_ref[...] = jnp.zeros_like(sqsum_ref)

    if xw_resident:
        # The whole per-view XW lives in VMEM: slice the k-th row block.
        start = pl.multiple_of(k * tile_k, tile_k)
        xw = xw_ref[0, pl.ds(start, tile_k), :]
    else:
        xw = xw_ref[0]

    partial = jnp.dot(a_ref[0], xw, preferred_element_type=jnp.float32)

    @pl.when(k == 0)
    def _():
        h_ref[0] = partial

    @pl.when(k > 0)
    def _():
        h_ref[0] = h_ref[0] + partial

    # When the row tile of H is complete, fold it into the column statistics.
    @pl.when(k == k_last)
    def _():
        h = h_ref[0]
        sum_ref[0] = sum_ref[0] + jnp.sum(h, axis=0, keepdims=True)
        sqsum_ref[0] = sqsum_ref[0] + jnp.sum(h * h, axis=0, keepdims=True)


# ---------------------------------------------------------------------------
# K3: Z = (H - mean) * rsqrt(var), unbiased variance (ddof = 1).
# ---------------------------------------------------------------------------
def _normalize_kernel(h_ref, sum_ref, sqsum_ref, z_ref, *, n_valid):
    h = h_ref[0]                                     # (TM, F_hid) f32
    mean = sum_ref[0] * (1.0 / n_valid)              # (1, F_hid)
    var = (sqsum_ref[0] - n_valid * mean * mean) * (1.0 / (n_valid - 1.0))
    var = jnp.maximum(var, 1e-12)   # padded columns have var == 0; keep NaN-free
    z_ref[0] = (h - mean) * lax.rsqrt(var)           # EUP rsqrt, once per column


def cca_aa_forward(a_hat_1, x_1, a_hat_2, x_2, weight, bias=None,
                   *, tile_m=1024, tile_k=1024):
    """Forward of CCA_AA (1-layer GCN backbone): returns (z1, z2).

    `bias` is accepted for API parity with GCNConv but intentionally unused:
    a per-column constant cancels exactly under (h - mean) / std.
    """
    del bias
    n, f_in = x_1.shape
    f_hid = weight.shape[1]

    vmem_budget = _vmem_budget_bytes()
    soft_cap = int(0.9 * vmem_budget)

    f_in_pad = _round_up(f_in, 128)
    f_hid_pad = _round_up(f_hid, 128)

    # ---- K2 tile selection (default 1024; capped by N; shrunk if VMEM-tight) --
    n_min_pad = _round_up(n, 128)
    tile_m = max(128, min(tile_m, n_min_pad))
    tile_k = max(128, min(tile_k, n_min_pad))

    def k2_streamed_bytes(tm, tk):
        return (2 * tm * tk * 2            # A blocks (bf16, double-buffered)
                + 2 * tk * f_hid_pad * 2   # XW k-blocks (bf16)
                + 2 * tm * f_hid_pad * 4   # resident H accumulator blocks (f32)
                + 4 * f_hid_pad * 4 * 2)   # stats blocks

    while k2_streamed_bytes(tile_m, tile_k) > soft_cap and max(tile_m, tile_k) > 128:
        if tile_m >= tile_k:
            tile_m //= 2
        else:
            tile_k //= 2
    tile_m = max(128, tile_m)
    tile_k = max(128, tile_k)

    n_pad = _round_up(n, _lcm(tile_m, tile_k))
    n_row_tiles = n_pad // tile_m
    n_k_tiles = n_pad // tile_k

    # Hold XW fully VMEM-resident per view when it fits: it is then read from
    # HBM once per view instead of once per row tile.
    k2_resident_bytes = (2 * tile_m * tile_k * 2
                         + 2 * n_pad * f_hid_pad * 2
                         + 2 * tile_m * f_hid_pad * 4
                         + 4 * f_hid_pad * 4 * 2)
    xw_resident = k2_resident_bytes <= soft_cap

    # ---- K1 / K3 row tiles (up to 2048, VMEM permitting) ----------------------
    def fits_k1(t):
        return (2 * t * f_in_pad * 2 + 2 * t * f_hid_pad * 2
                + 2 * f_in_pad * f_hid_pad * 2) <= soft_cap

    def fits_k3(t):
        return (4 * t * f_hid_pad * 4 + 4 * f_hid_pad * 4 * 2) <= soft_cap

    tile_m_xw = _largest_divisor_tile(n_pad, 2048, fits_k1)
    tile_m_nm = _largest_divisor_tile(n_pad, 2048, fits_k3)

    # ---- Pad + stack the two views (single fused cast/pad pass, bf16 out) ----
    def pad_stack(arrs, rows, cols, dtype):
        out = jnp.zeros((len(arrs), rows, cols), dtype)
        for idx, arr in enumerate(arrs):
            out = out.at[idx, :arr.shape[0], :arr.shape[1]].set(arr.astype(dtype))
        return out

    a = pad_stack([a_hat_1, a_hat_2], n_pad, n_pad, jnp.bfloat16)
    x = pad_stack([x_1, x_2], n_pad, f_in_pad, jnp.bfloat16)
    w = pad_stack([weight], f_in_pad, f_hid_pad, jnp.bfloat16)[0]

    def cparams(sems):
        return pltpu.CompilerParams(dimension_semantics=sems,
                                    vmem_limit_bytes=vmem_budget)

    # ---- K1: XW = X @ W -------------------------------------------------------
    xw = pl.pallas_call(
        _xw_kernel,
        out_shape=jax.ShapeDtypeStruct((2, n_pad, f_hid_pad), jnp.bfloat16),
        grid_spec=pltpu.PrefetchScalarGridSpec(
            num_scalar_prefetch=0,
            grid=(2, n_pad // tile_m_xw),
            in_specs=[
                pl.BlockSpec((1, tile_m_xw, f_in_pad), lambda v, i: (v, i, 0)),
                pl.BlockSpec((f_in_pad, f_hid_pad), lambda v, i: (0, 0)),
            ],
            out_specs=pl.BlockSpec((1, tile_m_xw, f_hid_pad),
                                   lambda v, i: (v, i, 0)),
        ),
        compiler_params=cparams(("parallel", "parallel")),
    )(x, w)

    # ---- K2: H = A_hat @ XW, fused column sum / sumsq ------------------------
    if xw_resident:
        # Per-view full-extent block: DMA'd once per view (block index is
        # constant across i and k), sliced per k-tile inside the kernel.
        xw_spec = pl.BlockSpec((1, n_pad, f_hid_pad), lambda v, i, k: (v, 0, 0))
    else:
        xw_spec = pl.BlockSpec((1, tile_k, f_hid_pad), lambda v, i, k: (v, k, 0))

    agg_kernel = functools.partial(_agg_stats_kernel, tile_k=tile_k,
                                   xw_resident=xw_resident)
    h, col_sum, col_sqsum = pl.pallas_call(
        agg_kernel,
        out_shape=(
            jax.ShapeDtypeStruct((2, n_pad, f_hid_pad), jnp.float32),
            jax.ShapeDtypeStruct((2, 1, f_hid_pad), jnp.float32),
            jax.ShapeDtypeStruct((2, 1, f_hid_pad), jnp.float32),
        ),
        grid_spec=pltpu.PrefetchScalarGridSpec(
            num_scalar_prefetch=0,
            grid=(2, n_row_tiles, n_k_tiles),
            in_specs=[
                pl.BlockSpec((1, tile_m, tile_k), lambda v, i, k: (v, i, k)),
                xw_spec,
            ],
            out_specs=(
                pl.BlockSpec((1, tile_m, f_hid_pad), lambda v, i, k: (v, i, 0)),
                pl.BlockSpec((1, 1, f_hid_pad), lambda v, i, k: (v, 0, 0)),
                pl.BlockSpec((1, 1, f_hid_pad), lambda v, i, k: (v, 0, 0)),
            ),
        ),
        compiler_params=cparams(("parallel", "arbitrary", "arbitrary")),
    )(a, xw)

    # ---- K3: Z = (H - mean) * rsqrt(var); H aliased onto Z -------------------
    norm_kernel = functools.partial(_normalize_kernel, n_valid=float(n))
    z = pl.pallas_call(
        norm_kernel,
        out_shape=jax.ShapeDtypeStruct((2, n_pad, f_hid_pad), jnp.float32),
        grid_spec=pltpu.PrefetchScalarGridSpec(
            num_scalar_prefetch=0,
            grid=(2, n_pad // tile_m_nm),
            in_specs=[
                pl.BlockSpec((1, tile_m_nm, f_hid_pad), lambda v, i: (v, i, 0)),
                pl.BlockSpec((1, 1, f_hid_pad), lambda v, i: (v, 0, 0)),
                pl.BlockSpec((1, 1, f_hid_pad), lambda v, i: (v, 0, 0)),
            ],
            out_specs=pl.BlockSpec((1, tile_m_nm, f_hid_pad),
                                   lambda v, i: (v, i, 0)),
        ),
        input_output_aliases={0: 0},   # write Z in place of H (no extra HBM buf)
        compiler_params=cparams(("parallel", "parallel")),
    )(h, col_sum, col_sqsum)

    z1 = z[0, :n, :f_hid]
    z2 = z[1, :n, :f_hid]
    return z1, z2


def normalized_adjacency(edge_index, n_nodes, *, dtype=jnp.bfloat16):
    """Dense D^{-1/2}(A+I)D^{-1/2}, matching torch_geometric GCNConv defaults.

    Plain-JAX glue (the edge_index scatter has no clean rectangular Pallas
    tiling at this scale); emitted directly in the kernel dtype (bf16) so the
    pre-kernel pass does not re-read/re-write an f32 copy of the N x N matrix.
    """
    src, dst = edge_index
    a = jnp.zeros((n_nodes, n_nodes), jnp.float32)
    a = a.at[dst, src].set(1.0)                      # message j -> i lands in row i
    a = a + jnp.eye(n_nodes, dtype=jnp.float32)      # add_self_loops=True
    deg = a.sum(axis=1)
    dinv = jnp.where(deg > 0, lax.rsqrt(deg), 0.0)
    return (a * dinv[:, None] * dinv[None, :]).astype(dtype)


def _reference(a_hat, x, w):
    h = a_hat @ (x @ w)
    mean = h.mean(axis=0, keepdims=True)
    std = jnp.std(h, axis=0, ddof=1, keepdims=True)
    return (h - mean) / std


if __name__ == "__main__":
    n_nodes, in_dim, hid_dim = 8, 16, 32   # small stand-ins for (in_dim, 512, 512)

    key = jax.random.PRNGKey(0)
    k1, k2, k3 = jax.random.split(key, 3)
    x1 = jax.random.normal(k1, (n_nodes, in_dim), jnp.float32)
    x2 = jax.random.normal(k2, (n_nodes, in_dim), jnp.float32)

    # Deterministic GCNConv parameter init: glorot-uniform weight, zero bias.
    limit = (6.0 / (in_dim + hid_dim)) ** 0.5
    weight = jax.random.uniform(k3, (in_dim, hid_dim), jnp.float32, -limit, limit)
    bias = jnp.zeros((hid_dim,), jnp.float32)

    # Two "augmented" graph views: symmetric edge lists (source row, target row).
    edge_index_1 = jnp.array(
        [[0, 1, 1, 2, 2, 3, 3, 4, 4, 5, 5, 6, 6, 7],
         [1, 0, 2, 1, 3, 2, 4, 3, 5, 4, 6, 5, 7, 6]], jnp.int32)
    edge_index_2 = jnp.array(
        [[0, 2, 1, 3, 2, 4, 3, 5, 4, 6, 5, 7, 6, 0],
         [2, 0, 3, 1, 4, 2, 5, 3, 6, 4, 7, 5, 0, 6]], jnp.int32)

    a_hat_1 = normalized_adjacency(edge_index_1, n_nodes)              # bf16 (kernel)
    a_hat_2 = normalized_adjacency(edge_index_2, n_nodes)
    a_hat_1_f32 = normalized_adjacency(edge_index_1, n_nodes, dtype=jnp.float32)
    a_hat_2_f32 = normalized_adjacency(edge_index_2, n_nodes, dtype=jnp.float32)

    z1, z2 = cca_aa_forward(a_hat_1, x1, a_hat_2, x2, weight, bias)
    jax.block_until_ready((z1, z2))
    assert z1.shape == (n_nodes, hid_dim) and z2.shape == (n_nodes, hid_dim)

    # Loose correctness check against an f32 reference (kernel uses bf16 inputs
    # with f32 accumulation for the matmuls).
    r1 = _reference(a_hat_1_f32, x1, weight)
    r2 = _reference(a_hat_2_f32, x2, weight)
    err1 = float(jnp.max(jnp.abs(z1 - r1)))
    err2 = float(jnp.max(jnp.abs(z2 - r2)))
    assert err1 < 0.1 and err2 < 0.1, (err1, err2)

    print("KERNEL_OK")
</pallas_src>

<mosaic_0001>
module attributes {stable_mosaic.version = 11 : i64} {
  func.func @_xw_kernel(%arg0: i32, %arg1: i32, %arg2: memref<1x128x128xbf16, #tpu.memory_space<vmem>>, %arg3: memref<128x128xbf16, #tpu.memory_space<vmem>>, %arg4: memref<1x128x128xbf16, #tpu.memory_space<vmem>>) attributes {dimension_semantics = [#tpu.dimension_semantics<parallel>, #tpu.dimension_semantics<parallel>], iteration_bounds = array<i64: 2, 1>, scalar_prefetch = 0 : i64, scratch_operands = 0 : i64, tpu.core_type = #tpu.core_type<tc>, window_params = [{transform_indices = @transform_0, window_bounds = array<i64: 1, 128, 128>}, {pipeline_mode = #tpu.pipeline_mode<synchronous>, transform_indices = @transform_1, window_bounds = array<i64: 128, 128>}, {transform_indices = @transform_2, window_bounds = array<i64: 1, 128, 128>}]} {
    %c0 = arith.constant 0 : index
    %c0_0 = arith.constant 0 : index
    %c0_1 = arith.constant 0 : index
    %0 = vector.load %arg2[%c0, %c0_0, %c0_1] : memref<1x128x128xbf16, #tpu.memory_space<vmem>>, vector<1x128x128xbf16>
    %1 = vector.shape_cast %0 : vector<1x128x128xbf16> to vector<128x128xbf16>
    %c0_2 = arith.constant 0 : index
    %c0_3 = arith.constant 0 : index
    %2 = vector.load %arg3[%c0_2, %c0_3] : memref<128x128xbf16, #tpu.memory_space<vmem>>, vector<128x128xbf16>
    %cst = arith.constant dense<0.000000e+00> : vector<128x128xf32>
    %3 = tpu.matmul %1, %2, %cst {dimension_numbers = #tpu.dot_dimension_numbers<[1], [0], [0], [1], [0, 0, 1, 1], [], []>} : vector<128x128xbf16>, vector<128x128xbf16>, vector<128x128xf32> -> vector<128x128xf32>
    %4 = arith.truncf %3 : vector<128x128xf32> to vector<128x128xbf16>
    %c0_4 = arith.constant 0 : index
    %c0_5 = arith.constant 0 : index
    %c0_6 = arith.constant 0 : index
    %5 = vector.load %arg4[%c0_4, %c0_5, %c0_6] : memref<1x128x128xbf16, #tpu.memory_space<vmem>>, vector<1x128x128xbf16>
    %6 = vector.shape_cast %5 : vector<1x128x128xbf16> to vector<128x128xbf16>
    %7 = vector.shape_cast %4 : vector<128x128xbf16> to vector<1x128x128xbf16>
    tpu.vector_store %arg4[%c0_4, %c0_5, %c0_6], %7 {strides = array<i32>} : memref<1x128x128xbf16, #tpu.memory_space<vmem>>, vector<1x128x128xbf16>,
    return
  }
  func.func @transform_0(%arg0: i32, %arg1: i32) -> (i32, i32, i32) {
    %c0_i32 = arith.constant 0 : i32
    %c0_i32_0 = arith.constant 0 : i32
    return %arg0, %arg1, %c0_i32 : i32, i32, i32
  }
  func.func @transform_1(%arg0: i32, %arg1: i32) -> (i32, i32) {
    %c0_i32 = arith.constant 0 : i32
    %c0_i32_0 = arith.constant 0 : i32
    %c0_i32_1 = arith.constant 0 : i32
    return %c0_i32, %c0_i32_0 : i32, i32
  }
  func.func @transform_2(%arg0: i32, %arg1: i32) -> (i32, i32, i32) {
    %c0_i32 = arith.constant 0 : i32
    %c0_i32_0 = arith.constant 0 : i32
    return %arg0, %arg1, %c0_i32 : i32, i32, i32
  }
}

</mosaic_0001>

<bundles_post_ra>
// kernel: tpu_custom_call.1
= control target key start
LH: loop header
LB: loop body
LE: loop exit
PB: predicated region body
PF: predicated region fallthrough
CT: control target
= control target key end

     0   :  { %7 = vsyncpa [#allocation3], 0  ;;  %s1109_s0 = inlined_call_operand.hbm [shape: bf16[2,128,128], index: 0, kind: input, shape index: {}]   ;;  %s1110_s1 = inlined_call_operand.hbm [shape: bf16[128,128], index: 1, kind: input, shape index: {}]   ;;  %s1111_s2 = inlined_call_operand.hbm [shape: bf16[2,128,128], index: 2, kind: output, shape index: {}]  }
   0x1   :  { %9 = vsyncpa [#allocation3 + $0x1], 0 }
   0x2   :  { %10 = vsyncpa [#allocation6], 0 }
   0x3   :  { %11 = vsyncpa [#allocation4], 0 }
   0x4   :  { %13 = vsyncpa [#allocation4 + $0x1], 0  ;;  %s940_s9 = smov 0   ;;  %s942_s10 = smov 0  }
   0x5   :  { %s944_s11 = smov 0   ;;  %s946_s12 = smov 0  }
   0x6   :  { %s948_s13 = smov 0   ;;  %s950_s14 = smov 0  }
   0x7 LB: > { %s525_s15 = sadd.s32 4294967295, %s918_s14   ;;  %s526_s16 = sadd.s32 4294967294, %s918_s14   ;;  %s918_s14 = sphi %s950_s14, %s19_s14   ;;  %s914_s13 = sphi %s948_s13, %s1123_s13   ;;  %s910_s12 = sphi %s946_s12, %s1122_s12   ;;  %s906_s11 = sphi %s944_s11, %s1121_s11   ;;  %s902_s10 = sphi %s942_s10, %s1120_s10   ;;  %s898_s9 = sphi %s940_s9, %s1119_s9  }
   0x8   : > { %p53_p0 = scmp.ne.s32.totalorder %s902_s10, %s898_s9  ;;  %p974_p1 = scmp.eq.s32.totalorder %s525_s15, 0 }
   0x9   : > { %p978_p2 = scmp.eq.s32.totalorder %s525_s15, 1  ;;  %p106_p3 = scmp.eq.s32.totalorder %s526_s16, 1 }
   0xa   : > { %p984_p4 = por %p974_p1, %p53_p0  ;;  %p527_p5 = scmp.ge.s32.totalorder %s918_s14, 1 }
   0xb   : > { %p989_p6 = por %p106_p3, %p53_p0  ;;  %p113_p7 = scmp.lt.s32.totalorder %s918_s14, 3 }
   0xc   : > { %s124_s23 = sshll.u32 %s1110_s1, 4  ;;  %s920_s25 = smov [#allocation5]   ;;  %s125_s23 = int_to_ptr.hbm [resolvable:$true] %s124_s23 }
   0xd   : > { %p997_p8 = pnand %p527_p5, %p113_p7  ;;  %s126_s26 = sshll.u32 %s920_s25, 4  ;;  %s127_s26 = int_to_ptr.vmem [resolvable:$true] %s126_s26 }
   0xe   : > { %p529_p11 = scmp.ge.s32.totalorder %s918_s14, 2  ;;  %s921_s27 = smov 64  }
   0xf   : > { %p703_p9 = pneg %p997_p8  ;;  %s922_s28 = smov 4  }
  0x10   : > { %s31_s29 = sadd.s32 1, %s914_s13  ;;  %s40_s30 = sadd.s32 1, %s906_s11 }
  0x11   : > { %p704_p10 = pnand %p703_p9, %p974_p1  ;;  %p33_p12 = scmp.ge.s32.totalorder %s31_s29, 2 }
  0x12   : > { %p47_p13 = scmp.ne.s32.totalorder %s906_s11, %s902_s10  ;;  %p48_p0 = scmp.eq.s32.totalorder %s918_s14, 0 }
  0x13   : > { %706 = dma.hbm_to_vmem [thread:$0]  (!%p704_p10), %s125_s23, 1024, %s127_s26, [#allocation6], %s921_s27, %s921_s27, %s922_s28  }
  0x14   : > { %s1125_s29 = smov (%p33_p12, %s31_s29), 0  ;;  %p1016_p3 = por %p48_p0, %p47_p13 }
  0x15   : > { %p1022_p5 = por %p978_p2, %p47_p13  ;;  %s35_s5 = ssub.s32 %s914_s13, %s1125_s29 }
  0x16   : > { %p716_p7 = scmp.lt.s32.totalorder %s918_s14, 2  ;;  %p38_p9 = scmp.eq.s32.totalorder %s35_s5, 0 }
  0x17   : > { %s140_s6 = sand.u32 1, %s906_s11   ;;  %s606_s15 = sshll.u32 %s914_s13, 6 }
  0x18   : > { %s530_s7 = sshll.u32 %s140_s6, 6  ;;  %s151_s22 = scalar_lea.hbm %s1109_s0, %s606_s15 }
  0x19   : > { %s1031_s8 = scalar_select %p38_p9, %s906_s11, %s40_s30  }
  0x1a   : > { %s144_s23 = scalar_lea.vmem [#allocation2], %s530_s7  ;;  %s152_s18 = sshll.u32 %s151_s22, 4  ;;  %s153_s18 = int_to_ptr.hbm [resolvable:$true] %s152_s18 }
  0x1b   : > { %s154_s25 = sshll.u32 %s144_s23, 4  ;;  %p708_p2 = pnand %p716_p7, %p1016_p3  ;;  %s155_s25 = int_to_ptr.vmem [resolvable:$true] %s154_s25 }
  0x1c   : > { %s141_s26 = scalar_lea.sflag [#allocation3], %s140_s6  ;;  %166 = sbr.rel (%p997_p8) target bundleno = 232 (0xe8), region = 28 }
  0x1d   : > { %710 = dma.hbm_to_vmem [thread:$0]  (!%p708_p2), %s153_s18, 1024, %s155_s25, %s141_s26, %s921_s27, %s921_s27, %s922_s28  }
  0x1e   : > { %s1045_s30 = sand.u32 (!%p997_p8), 1, %s902_s10  }
  0x1f   : > { %s534_s5 = sshll.u32 (!%p997_p8), %s1045_s30, 6  ;;  %s169_s7 = scalar_lea.sflag (!%p997_p8), [#allocation3], %s1045_s30 }
  0x20   : > { %s1051_s3 = scalar_lea.vmem (!%p997_p8), [#allocation2], %s534_s5 }
  0x21   : > { %885 = dma.done.wait (%p984_p4), %s169_s7, 1024  }
  0x22   : > { %887 = vsyncadd (%p984_p4), %s169_s7, 4294966272 }
  0x23   : > { %889 = dma.done.wait (%p974_p1), [#allocation6], 1024  }
  0x24   : > { %891 = vsyncadd (%p974_p1), [#allocation6], 4294966272  ;;  %v622_v0 = vld [vmem:[#allocation5 + $0x38] sm:$0xff]  ;;  %v621_v1 = vld [vmem:[#allocation5 + $0x30] sm:$0xff]  ;;  %s198_s17 = scalar_lea.vmem [#allocation7], %s534_s5  ;;  %s623_s19 = sshll.u32 %s910_s12, 6 }
  0x25   : > { %329 = vmatpush.bf16.msra.mxu0 %v622_v0  ;;  %671 = vmatpush.bf16.msra.mxu1 %v622_v0  ;;  %v620_v2 = vld [vmem:[#allocation5 + $0x28] sm:$0xff]  ;;  %v619_v3 = vld [vmem:[#allocation5 + $0x20] sm:$0xff]  ;;  %v618_v4 = vld [vmem:[#allocation5 + $0x18] sm:$0xff]  ;;  %s424_s28 = scalar_lea.hbm %s1111_s2, %s623_s19  ;;  %s425_s6 = sshll.u32 %s198_s17, 4  ;;  %s426_s6 = int_to_ptr.vmem [resolvable:$true] %s425_s6 }
  0x26   : > { %672 = vmatpush.bf16.msra.mxu2 %v622_v0  ;;  %673 = vmatpush.bf16.msra.mxu3 %v622_v0  ;;  %v617_v5 = vld [vmem:[#allocation5 + $0x10] sm:$0xff]  ;;  %v616_v6 = vld [vmem:[#allocation5 + $0x8] sm:$0xff]  ;;  %v615_v7 = vld [vmem:[#allocation5] sm:$0xff]  ;;  %s427_s15 = sshll.u32 %s424_s28, 4  ;;  %s411_s12 = scalar_lea.sflag [#allocation4], %s1045_s30  ;;  %s428_s15 = int_to_ptr.hbm [resolvable:$true] %s427_s15 }
  0x27   : > { %v607_v8 = vld [vmem:[%s1051_s3] sm:$0xff]  ;;  %v609_v9 = vld [vmem:[%s1051_s3 + $0x10] sm:$0xff]  ;;  %v608_v12 = vld [vmem:[%s1051_s3 + $0x8] sm:$0xff]  ;;  %s846_s16 = sshra.s32 %s428_s15, 4  ;;  %s852_s25 = scalar_lea.hbm %s1111_s2, 128  ;;  %s847_s16 = int_to_ptr.hbm [resolvable:$true] %s846_s16 }
  0x28   : > { %v611_v10 = vld [vmem:[%s1051_s3 + $0x20] sm:$0xff]  ;;  %v613_v11 = vld [vmem:[%s1051_s3 + $0x30] sm:$0xff]  ;;  %v610_v13 = vld [vmem:[%s1051_s3 + $0x18] sm:$0xff]  ;;  %s848_s21 = scalar_lea.hbm %s847_s16, 64  ;;  %p853_p10 = scmp.lt.s32.totalorder %s847_s16, %s1111_s2 }
  0x29   : > { %330 = vmatpush.bf16.msra.mxu0 %v621_v1  ;;  %674 = vmatpush.bf16.msra.mxu1 %v621_v1  ;;  %v612_v14 = vld [vmem:[%s1051_s3 + $0x28] sm:$0xff]  ;;  %v614_v15 = vld [vmem:[%s1051_s3 + $0x38] sm:$0xff]  ;;  %p849_p1 = scmp.ne.s32.totalorder %s847_s16, %s848_s21  ;;  %p854_p12 = scmp.lt.s32.totalorder %s852_s25, %s848_s21 }
  0x2a   : > { %675 = vmatpush.bf16.msra.mxu2 %v621_v1  ;;  %676 = vmatpush.bf16.msra.mxu3 %v621_v1 }
  0x2b   : > { %p850_p4 = pnand %p849_p1, %p1022_p5  ;;  %p855_p13 = por %p854_p12, %p853_p10 }
  0x2d   : > { %331 = vmatpush.bf16.msra.mxu0 %v620_v2  ;;  %677 = vmatpush.bf16.msra.mxu1 %v620_v2  ;;  %p851_p8 = pneg %p850_p4 }
  0x2e   : > { %678 = vmatpush.bf16.msra.mxu2 %v620_v2  ;;  %679 = vmatpush.bf16.msra.mxu3 %v620_v2 }
  0x2f   : > { %p856_p0 = pnand %p855_p13, %p851_p8 }
  0x31   : > { %332 = vmatpush.bf16.msra.mxu0 %v619_v3  ;;  %680 = vmatpush.bf16.msra.mxu1 %v619_v3 }
  0x32   : > { %681 = vmatpush.bf16.msra.mxu2 %v619_v3  ;;  %682 = vmatpush.bf16.msra.mxu3 %v619_v3 }
  0x35   : > { %333 = vmatpush.bf16.msra.mxu0 %v618_v4  ;;  %683 = vmatpush.bf16.msra.mxu1 %v618_v4 }
  0x36   : > { %684 = vmatpush.bf16.msra.mxu2 %v618_v4  ;;  %685 = vmatpush.bf16.msra.mxu3 %v618_v4 }
  0x39   : > { %334 = vmatpush.bf16.msra.mxu0 %v617_v5  ;;  %686 = vmatpush.bf16.msra.mxu1 %v617_v5 }
  0x3a   : > { %687 = vmatpush.bf16.msra.mxu2 %v617_v5  ;;  %688 = vmatpush.bf16.msra.mxu3 %v617_v5 }
  0x3d   : > { %335 = vmatpush.bf16.msra.mxu0 %v616_v6  ;;  %689 = vmatpush.bf16.msra.mxu1 %v616_v6 }
  0x3e   : > { %690 = vmatpush.bf16.msra.mxu2 %v616_v6  ;;  %691 = vmatpush.bf16.msra.mxu3 %v616_v6 }
  0x41   : > { %336 = vmatpush.bf16.msra.mxu0 %v615_v7  ;;  %692 = vmatpush.bf16.msra.mxu1 %v615_v7 }
  0x42   : > { %693 = vmatpush.bf16.msra.mxu2 %v615_v7  ;;  %694 = vmatpush.bf16.msra.mxu3 %v615_v7 }
  0x44   : > { %337 = vmatmul.bf16.vlgmr.msra.gmra.mxu0 %v607_v8  ;;  %347 = vmatmul.bf16.vlgmr.msra.gmra.mxu1 %v609_v9 }
  0x45   : > { %357 = vmatmul.bf16.vlgmr.msra.gmra.mxu2 %v611_v10  ;;  %367 = vmatmul.bf16.vlgmr.msra.gmra.mxu3 %v613_v11 }
  0x54   : > { %342 = vmatmul.bf16.gmra.mxu0 %v608_v12  ;;  %352 = vmatmul.bf16.gmra.mxu1 %v610_v13 }
  0x55   : > { %362 = vmatmul.bf16.gmra.mxu2 %v612_v14  ;;  %372 = vmatmul.bf16.gmra.mxu3 %v614_v15 }
  0xc1   : > { %v338_v16 = vpop.f32.mrf.mxu0  ;;  %v348_v17 = vpop.f32.mrf.mxu1 }
  0xc8   : > { %v358_v18 = vpop.f32.mrf.mxu2  ;;  %v368_v19 = vpop.f32.mrf.mxu3 }
  0xc9   : > { %v340_v20 = vpop.f32.mrf.mxu0  ;;  %v350_v21 = vpop.f32.mrf.mxu1 }
  0xca   : > { %v627_v22 = vpack.c.bf16 %v340_v20, %v338_v16  ;;  %v637_v23 = vpack.c.bf16 %v350_v21, %v348_v17 }
  0xcc   : > { %628 = vst [vmem:[%s198_s17] sm:$0xff] %v627_v22  }
  0xcd   : > { %665 = vst [vmem:[%s198_s17 + $0x10] sm:$0xff] %v637_v23  }
  0xd0   : > { %v360_v24 = vpop.f32.mrf.mxu2  ;;  %v370_v25 = vpop.f32.mrf.mxu3 }
  0xd1   : > { %v647_v26 = vpack.c.bf16 %v360_v24, %v358_v18  ;;  %v657_v27 = vpack.c.bf16 %v370_v25, %v368_v19  ;;  %v343_v28 = vpop.f32.mrf.mxu0  ;;  %v353_v29 = vpop.f32.mrf.mxu1 }
  0xd3   : > { %667 = vst [vmem:[%s198_s17 + $0x20] sm:$0xff] %v647_v26  }
  0xd4   : > { %669 = vst [vmem:[%s198_s17 + $0x30] sm:$0xff] %v657_v27  }
  0xd8   : > { %v363_v30 = vpop.f32.mrf.mxu2  ;;  %v373_v31 = vpop.f32.mrf.mxu3 }
  0xd9   : > { %v345_v32 = vpop.f32.mrf.mxu0  ;;  %v355_v33 = vpop.f32.mrf.mxu1 }
  0xda   : > { %v632_v34 = vpack.c.bf16 %v345_v32, %v343_v28  ;;  %v642_v35 = vpack.c.bf16 %v355_v33, %v353_v29 }
  0xdc   : > { %664 = vst [vmem:[%s198_s17 + $0x8] sm:$0xff] %v632_v34  }
  0xdd   : > { %666 = vst [vmem:[%s198_s17 + $0x18] sm:$0xff] %v642_v35  }
  0xe0   : > { %v365_v36 = vpop.f32.mrf.mxu2  ;;  %v375_v37 = vpop.f32.mrf.mxu3 }
  0xe1   : > { %v652_v38 = vpack.c.bf16 %v365_v36, %v363_v30  ;;  %v662_v39 = vpack.c.bf16 %v375_v37, %v373_v31 }
  0xe3   : > { %668 = vst [vmem:[%s198_s17 + $0x28] sm:$0xff] %v652_v38  }
  0xe4   : > { %670 = vst [vmem:[%s198_s17 + $0x38] sm:$0xff] %v662_v39  }
  0xe5   : > { %859 = shalt.err (!%p856_p0)
}
  0xe6   : > { %s923_s30 = smov 64   ;;  %s924_s5 = smov 4  }
  0xe7   : > { %701 = dma.vmem_to_hbm [thread:$0]  (%p1022_p5), %s426_s6, 1024, %s428_s15, %s411_s12, %s923_s30, %s923_s30, %s924_s5  }
  0xe8 PF: > { %s442_s7 = sand.u32 1, %s898_s9   ;;  %p712_p3 = pnand %p529_p11, %p989_p6 }
  0xe9   : > { %s443_s3 = scalar_lea.sflag [#allocation4], %s442_s7 }
  0xea   : > { %p713_p7 = pneg %p712_p3 }
  0xec   : > { %893 = dma.done.wait (%p713_p7), %s443_s3, 1024  }
  0xed   : > { %895 = vsyncadd (%p713_p7), %s443_s3, 4294966272  ;;  %s19_s14 = sadd.s32 1, %s918_s14   ;;  %s1119_s9 = smov %s902_s10 }
  0xee   : > { %p16_p9 = scmp.ge.s32.totalorder %s19_s14, 4   ;;  %s1120_s10 = smov %s906_s11 }
  0xef   : > { %s1121_s11 = smov %s1031_s8  ;;  %s1122_s12 = smov %s914_s13 }
  0xf0   : > { %s1123_s13 = smov %s1125_s29  ;;  %18 = sbr.rel (!%p16_p9) target bundleno = 7 (0x7), region = 77 }
  0xf5   :  { %449 = vsyncpa [#allocation3], 1 }
  0xf6   :  { %451 = vsyncpa [#allocation3 + $0x1], 1 }
  0xf7   :  { %452 = vsyncpa [#allocation6], 1 }
  0xf8   :  { %453 = vsyncpa [#allocation4], 1 }
  0xf9   :  { %455 = vsyncpa [#allocation4 + $0x1], 1 }

</bundles_post_ra>
